<compile_context>
chip_gen: v7x
topology: tpu7x:2x2x1
jax: 0.10.0
libtpu: 0.0.40
codegen_flags: <defaults>
</compile_context>

<pallas_src>
import jax
import jax.numpy as jnp
from jax.experimental import pallas as pl
from jax.experimental.pallas import tpu as pltpu

NEG_SLOPE = 0.01                  # nn.LeakyReLU() default negative_slope
LANE = 128                        # vreg lane width: pad feature dims to this
SUBLANE = 16                      # bf16 sublane packing: row tiles multiple of 16
VMEM_BUDGET = 48 * 1024 * 1024    # resident-footprint budget (v7x has 64 MiB)


def _round_up(v, m):
    return ((v + m - 1) // m) * m


def _vmem_footprint(tm, cin_p, hid_p, cout_p):
    """Approximate resident VMEM bytes for a given row tile."""
    x_tile = 2 * tm * cin_p * 2            # double-buffered bf16 input tile
    o_tile = 2 * tm * cout_p * 4           # double-buffered f32 output tile
    h_tile = tm * hid_p * 4                # f32 hidden intermediate
    weights = (cin_p * hid_p + hid_p * cout_p) * 2   # single-buffered bf16
    biases = 8 * (hid_p + cout_p) * 4      # f32, sublane-padded
    return x_tile + o_tile + h_tile + weights + biases


def _choose_tm(m, cin_p, hid_p, cout_p, requested):
    if requested is not None:
        tm = _round_up(max(int(requested), SUBLANE), SUBLANE)
    else:
        tm = min(1024, _round_up(m, SUBLANE))
    # Shrink until the resident footprint fits the budget (v7x-safe).
    while tm > SUBLANE and _vmem_footprint(tm, cin_p, hid_p, cout_p) > VMEM_BUDGET:
        tm = max(SUBLANE, _round_up(tm // 2, SUBLANE))
    return tm


def _mlp_kernel(x_ref, w1_ref, b1_ref, w2_ref, b2_ref, o_ref):
    # fc1: (tm, Cin) @ (Cin, H) on the MXU, bf16 inputs, f32 accumulation.
    h = jnp.dot(x_ref[...], w1_ref[...], preferred_element_type=jnp.float32)
    h = h + b1_ref[...]                    # (1, H) f32 bias broadcast
    h = jnp.maximum(h, NEG_SLOPE * h)      # LeakyReLU, f32 on the VPU
    # dropout (eval mode) == identity
    # fc2: (tm, H) @ (H, Cout); activation downcast to bf16 for the MXU.
    y = jnp.dot(h.astype(w2_ref.dtype), w2_ref[...],
                preferred_element_type=jnp.float32)
    y = y + b2_ref[...]
    # dropout (eval mode) == identity
    o_ref[...] = y.astype(o_ref.dtype)


def mlp_forward(x, w1, b1, w2, b2, *, block_rows=None,
                compute_dtype=jnp.bfloat16):
    """Fused MLP forward.

    x: (..., Cin); w1: (Cin, H) = fc1.weight.T; b1: (H,);
    w2: (H, Cout) = fc2.weight.T; b2: (Cout,).
    """
    orig_shape = x.shape
    cin = orig_shape[-1]
    hidden = w1.shape[1]
    cout = w2.shape[1]

    x2d = x.reshape(-1, cin)
    m = x2d.shape[0]

    # Lane-dense padded feature dims.
    cin_p = _round_up(cin, LANE)
    hid_p = _round_up(hidden, LANE)
    cout_p = _round_up(cout, LANE)

    tm = _choose_tm(m, cin_p, hid_p, cout_p, block_rows)
    m_p = _round_up(m, tm)

    x_p = jnp.pad(x2d, ((0, m_p - m), (0, cin_p - cin))).astype(compute_dtype)
    w1_p = jnp.pad(w1, ((0, cin_p - cin), (0, hid_p - hidden))).astype(compute_dtype)
    w2_p = jnp.pad(w2, ((0, hid_p - hidden), (0, cout_p - cout))).astype(compute_dtype)
    b1_p = jnp.pad(b1, (0, hid_p - hidden)).astype(jnp.float32).reshape(1, hid_p)
    b2_p = jnp.pad(b2, (0, cout_p - cout)).astype(jnp.float32).reshape(1, cout_p)

    out_dtype = x.dtype
    csize = jnp.dtype(compute_dtype).itemsize
    cost = pl.CostEstimate(
        flops=2 * m_p * (cin_p * hid_p + hid_p * cout_p),
        transcendentals=0,
        bytes_accessed=(m_p * cin_p * csize
                        + (cin_p * hid_p + hid_p * cout_p) * csize
                        + (hid_p + cout_p) * 4
                        + m_p * cout_p * jnp.dtype(out_dtype).itemsize),
    )

    vmem_limit = int(min(64 * 1024 * 1024,
                         max(16 * 1024 * 1024,
                             2 * _vmem_footprint(tm, cin_p, hid_p, cout_p))))

    out_p = pl.pallas_call(
        _mlp_kernel,
        out_shape=jax.ShapeDtypeStruct((m_p, cout_p), out_dtype),
        grid_spec=pltpu.PrefetchScalarGridSpec(
            num_scalar_prefetch=0,
            grid=(m_p // tm,),
            in_specs=[
                pl.BlockSpec((tm, cin_p), lambda i: (i, 0)),          # x rows
                pl.BlockSpec((cin_p, hid_p), lambda i: (0, 0),        # w1
                             pipeline_mode=pl.Buffered(1)),
                pl.BlockSpec((1, hid_p), lambda i: (0, 0),            # b1
                             pipeline_mode=pl.Buffered(1)),
                pl.BlockSpec((hid_p, cout_p), lambda i: (0, 0),       # w2
                             pipeline_mode=pl.Buffered(1)),
                pl.BlockSpec((1, cout_p), lambda i: (0, 0),           # b2
                             pipeline_mode=pl.Buffered(1)),
            ],
            out_specs=pl.BlockSpec((tm, cout_p), lambda i: (i, 0)),
        ),
        compiler_params=pltpu.CompilerParams(
            dimension_semantics=("parallel",),
            vmem_limit_bytes=vmem_limit),
        cost_estimate=cost,
    )(x_p, w1_p, b1_p, w2_p, b2_p)

    return out_p[:m, :cout].reshape(*orig_shape[:-1], cout)


def _reference_mlp_f32(x, w1, b1, w2, b2):
    h = x @ w1 + b1
    h = jnp.where(h > 0, h, NEG_SLOPE * h)
    return h @ w2 + b2


def _reference_mlp_bf16(x, w1, b1, w2, b2):
    # Matches the kernel's mixed-precision path (bf16 operands, f32 accum).
    h = jnp.dot(x.astype(jnp.bfloat16), w1.astype(jnp.bfloat16),
                preferred_element_type=jnp.float32) + b1
    h = jnp.maximum(h, NEG_SLOPE * h)
    return jnp.dot(h.astype(jnp.bfloat16), w2.astype(jnp.bfloat16),
                   preferred_element_type=jnp.float32) + b2


if __name__ == "__main__":
    # Small shapes implied by the module: tokens (batch=2, seq=8), in=32,
    # hidden=64, out=32.
    B, S = 2, 8
    IN_F, HID_F, OUT_F = 32, 64, 32

    key = jax.random.PRNGKey(0)
    kx, k1, k2, k3, k4 = jax.random.split(key, 5)

    x = jax.random.normal(kx, (B, S, IN_F), dtype=jnp.float32)

    # Deterministic parameter init (uniform, roughly matching nn.Linear scale).
    bound1 = 1.0 / (IN_F ** 0.5)
    bound2 = 1.0 / (HID_F ** 0.5)
    w1 = jax.random.uniform(k1, (IN_F, HID_F), minval=-bound1, maxval=bound1,
                            dtype=jnp.float32)   # (in, hidden) = fc1.weight.T
    b1 = jax.random.uniform(k2, (HID_F,), minval=-bound1, maxval=bound1,
                            dtype=jnp.float32)
    w2 = jax.random.uniform(k3, (HID_F, OUT_F), minval=-bound2, maxval=bound2,
                            dtype=jnp.float32)   # (hidden, out) = fc2.weight.T
    b2 = jax.random.uniform(k4, (OUT_F,), minval=-bound2, maxval=bound2,
                            dtype=jnp.float32)

    out = mlp_forward(x, w1, b1, w2, b2)
    out = jax.block_until_ready(out)
    assert out.shape == (B, S, OUT_F)

    x2d = x.reshape(-1, IN_F)
    ref_bf16 = _reference_mlp_bf16(x2d, w1, b1, w2, b2).reshape(B, S, OUT_F)
    ref_f32 = _reference_mlp_f32(x2d, w1, b1, w2, b2).reshape(B, S, OUT_F)

    # Tight check against the precision-matched reference...
    assert jnp.allclose(out, ref_bf16, atol=1e-3, rtol=1e-3), \
        "mismatch vs bf16-matched reference"
    # ...and a loose sanity check against the full-f32 reference.
    assert jnp.allclose(out, ref_f32, atol=5e-2), \
        "mismatch vs f32 reference"

    print("KERNEL_OK")
</pallas_src>

<mosaic_0001>
module attributes {stable_mosaic.version = 11 : i64} {
  func.func @_mlp_kernel(%arg0: i32, %arg1: memref<16x128xbf16, #tpu.memory_space<vmem>>, %arg2: memref<128x128xbf16, #tpu.memory_space<vmem>>, %arg3: memref<1x128xf32, #tpu.memory_space<vmem>>, %arg4: memref<128x128xbf16, #tpu.memory_space<vmem>>, %arg5: memref<1x128xf32, #tpu.memory_space<vmem>>, %arg6: memref<16x128xf32, #tpu.memory_space<vmem>>) attributes {dimension_semantics = [#tpu.dimension_semantics<parallel>], iteration_bounds = array<i64: 1>, scalar_prefetch = 0 : i64, scratch_operands = 0 : i64, tpu.core_type = #tpu.core_type<tc>, window_params = [{transform_indices = @transform_0, window_bounds = array<i64: 16, 128>}, {pipeline_mode = #tpu.pipeline_mode<synchronous>, transform_indices = @transform_1, window_bounds = array<i64: 128, 128>}, {pipeline_mode = #tpu.pipeline_mode<synchronous>, transform_indices = @transform_2, window_bounds = array<i64: 1, 128>}, {pipeline_mode = #tpu.pipeline_mode<synchronous>, transform_indices = @transform_3, window_bounds = array<i64: 128, 128>}, {pipeline_mode = #tpu.pipeline_mode<synchronous>, transform_indices = @transform_4, window_bounds = array<i64: 1, 128>}, {transform_indices = @transform_5, window_bounds = array<i64: 16, 128>}]} {
    %c0 = arith.constant 0 : index
    %c0_0 = arith.constant 0 : index
    %0 = vector.load %arg1[%c0, %c0_0] : memref<16x128xbf16, #tpu.memory_space<vmem>>, vector<16x128xbf16>
    %c0_1 = arith.constant 0 : index
    %c0_2 = arith.constant 0 : index
    %1 = vector.load %arg2[%c0_1, %c0_2] : memref<128x128xbf16, #tpu.memory_space<vmem>>, vector<128x128xbf16>
    %cst = arith.constant dense<0.000000e+00> : vector<16x128xf32>
    %2 = tpu.matmul %0, %1, %cst {dimension_numbers = #tpu.dot_dimension_numbers<[1], [0], [0], [1], [0, 0, 1, 1], [], []>} : vector<16x128xbf16>, vector<128x128xbf16>, vector<16x128xf32> -> vector<16x128xf32>
    %c0_3 = arith.constant 0 : index
    %c0_4 = arith.constant 0 : index
    %3 = vector.load %arg3[%c0_3, %c0_4] : memref<1x128xf32, #tpu.memory_space<vmem>>, vector<1x128xf32>
    %4 = vector.broadcast %3 : vector<1x128xf32> to vector<16x128xf32>
    %5 = arith.addf %2, %4 : vector<16x128xf32>
    %cst_5 = arith.constant 0.00999999977 : f32
    %6 = vector.broadcast %cst_5 : f32 to vector<16x128xf32>
    %7 = arith.mulf %6, %5 : vector<16x128xf32>
    %8 = arith.maximumf %5, %7 : vector<16x128xf32>
    %9 = arith.truncf %8 : vector<16x128xf32> to vector<16x128xbf16>
    %c0_6 = arith.constant 0 : index
    %c0_7 = arith.constant 0 : index
    %10 = vector.load %arg4[%c0_6, %c0_7] : memref<128x128xbf16, #tpu.memory_space<vmem>>, vector<128x128xbf16>
    %cst_8 = arith.constant dense<0.000000e+00> : vector<16x128xf32>
    %11 = tpu.matmul %9, %10, %cst_8 {dimension_numbers = #tpu.dot_dimension_numbers<[1], [0], [0], [1], [0, 0, 1, 1], [], []>} : vector<16x128xbf16>, vector<128x128xbf16>, vector<16x128xf32> -> vector<16x128xf32>
    %c0_9 = arith.constant 0 : index
    %c0_10 = arith.constant 0 : index
    %12 = vector.load %arg5[%c0_9, %c0_10] : memref<1x128xf32, #tpu.memory_space<vmem>>, vector<1x128xf32>
    %13 = vector.broadcast %12 : vector<1x128xf32> to vector<16x128xf32>
    %14 = arith.addf %11, %13 : vector<16x128xf32>
    %c0_11 = arith.constant 0 : index
    %c0_12 = arith.constant 0 : index
    %15 = vector.load %arg6[%c0_11, %c0_12] : memref<16x128xf32, #tpu.memory_space<vmem>>, vector<16x128xf32>
    tpu.vector_store %arg6[%c0_11, %c0_12], %14 {strides = array<i32>} : memref<16x128xf32, #tpu.memory_space<vmem>>, vector<16x128xf32>,
    return
  }
  func.func @transform_0(%arg0: i32) -> (i32, i32) {
    %c0_i32 = arith.constant 0 : i32
    %c0_i32_0 = arith.constant 0 : i32
    return %arg0, %c0_i32 : i32, i32
  }
  func.func @transform_1(%arg0: i32) -> (i32, i32) {
    %c0_i32 = arith.constant 0 : i32
    %c0_i32_0 = arith.constant 0 : i32
    %c0_i32_1 = arith.constant 0 : i32
    return %c0_i32, %c0_i32_0 : i32, i32
  }
  func.func @transform_2(%arg0: i32) -> (i32, i32) {
    %c0_i32 = arith.constant 0 : i32
    %c0_i32_0 = arith.constant 0 : i32
    %c0_i32_1 = arith.constant 0 : i32
    return %c0_i32, %c0_i32_0 : i32, i32
  }
  func.func @transform_3(%arg0: i32) -> (i32, i32) {
    %c0_i32 = arith.constant 0 : i32
    %c0_i32_0 = arith.constant 0 : i32
    %c0_i32_1 = arith.constant 0 : i32
    return %c0_i32, %c0_i32_0 : i32, i32
  }
  func.func @transform_4(%arg0: i32) -> (i32, i32) {
    %c0_i32 = arith.constant 0 : i32
    %c0_i32_0 = arith.constant 0 : i32
    %c0_i32_1 = arith.constant 0 : i32
    return %c0_i32, %c0_i32_0 : i32, i32
  }
  func.func @transform_5(%arg0: i32) -> (i32, i32) {
    %c0_i32 = arith.constant 0 : i32
    %c0_i32_0 = arith.constant 0 : i32
    return %arg0, %c0_i32 : i32, i32
  }
}

</mosaic_0001>

<bundles_post_ra>
// kernel: tpu_custom_call.1
= control target key start
LH: loop header
LB: loop body
LE: loop exit
PB: predicated region body
PF: predicated region fallthrough
CT: control target
= control target key end

     0   :  { %10 = vsyncpa [#allocation3], 0  ;;  %s628_s0 = inlined_call_operand.hbm [shape: bf16[16,128], index: 0, kind: input, shape index: {}]   ;;  %s629_s1 = inlined_call_operand.hbm [shape: bf16[128,128], index: 1, kind: input, shape index: {}]   ;;  %s630_s2 = inlined_call_operand.vmem [shape: f32[1,128], index: 2, kind: input, shape index: {}]   ;;  %s631_s3 = inlined_call_operand.hbm [shape: bf16[128,128], index: 3, kind: input, shape index: {}]   ;;  %s632_s4 = inlined_call_operand.vmem [shape: f32[1,128], index: 4, kind: input, shape index: {}]   ;;  %s633_s5 = inlined_call_operand.hbm [shape: f32[16,128], index: 5, kind: output, shape index: {}]  }
   0x1   :  { %11 = vsyncpa [#allocation6], 0 }
   0x2   :  { %12 = vsyncpa [#allocation4], 0  ;;  %s518_s18 = smov [#allocation5]   ;;  %s519_s20 = smov [#allocation2]  }
   0x3   :  { %s30_s19 = sshll.u32 %s518_s18, 4  ;;  %s18_s21 = sshll.u32 %s519_s20, 4  ;;  %s31_s19 = int_to_ptr.vmem [resolvable:$true] %s30_s19  ;;  %s558_s21 = int_to_ptr.vmem [resolvable:$true] %s18_s21 }
   0x4   :  { %s424_s24 = scalar_lea.hbm %s629_s1, 1024 }
   0x5   :  { %p425_p0 = scmp.ne.s32.totalorder %s629_s1, %s424_s24  ;;  %p428_p1 = scmp.lt.u32.totalorder %s424_s24, %s629_s1 }
   0x7   :  { %p430_p2 = pnand %p428_p1, %p425_p0 }
   0x9   :  { %433 = shalt.err (!%p430_p2)
}
   0xa   :  { %s434_s29 = scalar_lea.vmem %s31_s19, 1024  ;;  %p439_p4 = scmp.lt.s32.totalorder %s31_s19, %s31_s19 }
   0xb   :  { %p435_p3 = scmp.ne.s32.totalorder %s31_s19, %s434_s29  ;;  %p440_p5 = scmp.lt.s32.totalorder %s434_s29, %s434_s29 }
   0xd   :  { %p441_p6 = por %p440_p5, %p439_p4 }
   0xf   :  { %p442_p7 = pnand %p441_p6, %p435_p3 }
  0x11   :  { %445 = shalt.err (!%p442_p7)
}
  0x12   :  { %s520_s30 = smov 64   ;;  %s521_s6 = smov 4  }
  0x13   :  { %36 = dma.hbm_to_vmem [thread:$0]  %s629_s1, 1024, %s31_s19, [#allocation6], %s520_s30, %s520_s30, %s521_s6  }
  0x14   :  { %s446_s11 = scalar_lea.hbm %s628_s0, 128 }
  0x15   :  { %p447_p8 = scmp.ne.s32.totalorder %s628_s0, %s446_s11  ;;  %p450_p9 = scmp.lt.u32.totalorder %s446_s11, %s628_s0 }
  0x17   :  { %p452_p10 = pnand %p450_p9, %p447_p8 }
  0x19   :  { %455 = shalt.err (!%p452_p10)
}
  0x1a   :  { %s456_s16 = scalar_lea.vmem %s558_s21, 128  ;;  %p461_p12 = scmp.lt.s32.totalorder %s558_s21, %s558_s21 }
  0x1b   :  { %p457_p11 = scmp.ne.s32.totalorder %s558_s21, %s456_s16  ;;  %p462_p13 = scmp.lt.s32.totalorder %s456_s16, %s456_s16 }
  0x1d   :  { %p463_p0 = por %p462_p13, %p461_p12 }
  0x1f   :  { %p464_p1 = pnand %p463_p0, %p457_p11 }
  0x21   :  { %467 = shalt.err (!%p464_p1)
}
  0x22   :  { %24 = dma.hbm_to_vmem [thread:$0]  %s628_s0, 128, %s558_s21, [#allocation3], %s520_s30, %s520_s30, %s521_s6  }
  0x23   :  { %s522_s18 = smov [#allocation7]   ;;  %s468_s23 = scalar_lea.hbm %s631_s3, 1024 }
  0x24   :  { %s44_s19 = sshll.u32 %s522_s18, 4  ;;  %p469_p2 = scmp.ne.s32.totalorder %s631_s3, %s468_s23  ;;  %s45_s19 = int_to_ptr.vmem [resolvable:$true] %s44_s19 }
  0x25   :  { %p472_p3 = scmp.lt.u32.totalorder %s468_s23, %s631_s3 }
  0x27   :  { %p474_p4 = pnand %p472_p3, %p469_p2 }
  0x29   :  { %477 = shalt.err (!%p474_p4)
}
  0x2a   :  { %s478_s28 = scalar_lea.vmem %s45_s19, 1024  ;;  %p483_p6 = scmp.lt.s32.totalorder %s45_s19, %s45_s19 }
  0x2b   :  { %p479_p5 = scmp.ne.s32.totalorder %s45_s19, %s478_s28  ;;  %p484_p7 = scmp.lt.s32.totalorder %s478_s28, %s478_s28 }
  0x2d   :  { %p485_p8 = por %p484_p7, %p483_p6 }
  0x2f   :  { %p486_p9 = pnand %p485_p8, %p479_p5 }
  0x31   :  { %489 = shalt.err (!%p486_p9)
}
  0x32   :  { %50 = dma.hbm_to_vmem [thread:$0]  %s631_s3, 1024, %s45_s19, [#allocation6], %s520_s30, %s520_s30, %s521_s6  }
  0x33   :  { %512 = dma.done.wait [#allocation3], 128  }
  0x34   :  { %513 = vsyncadd [#allocation3], 4294967168 }
  0x35   :  { %514 = dma.done.wait [#allocation6], 2048  }
  0x36   :  { %515 = vsyncadd [#allocation6], 4294965248  ;;  %v523_v0 = vmov 0.0   ;;  %vm524_vm0 = vmmov 0   ;;  %v407_v1 = vld [vmem:[#allocation5] sm:$0xff]   ;;  %v408_v2 = vld [vmem:[#allocation5 + $0x8] sm:$0xff]  }
  0x37   :  { %357 = vmatprep.subr.bf16.mxu0 %v523_v0  ;;  %373 = vmatprep.mubr.msk.bf16.mxu0 %vm524_vm0, %v523_v0  ;;  %v409_v3 = vld [vmem:[#allocation5 + $0x10] sm:$0xff]   ;;  %v416_v4 = vld [vmem:[#allocation7] sm:$0xff]   ;;  %v410_v5 = vld [vmem:[#allocation5 + $0x18] sm:$0xff]   ;;  %s525_s7 = smov [#allocation8]  }
  0x38   :  { %377 = vmatprep.subr.bf16.mxu1 %v523_v0  ;;  %393 = vmatprep.mubr.msk.bf16.mxu1 %vm524_vm0, %v523_v0  ;;  %v417_v6 = vld [vmem:[#allocation7 + $0x8] sm:$0xff]   ;;  %v411_v7 = vld [vmem:[#allocation5 + $0x20] sm:$0xff]   ;;  %v418_v8 = vld [vmem:[#allocation7 + $0x10] sm:$0xff]   ;;  %s307_s8 = sshll.u32 %s525_s7, 4  ;;  %s308_s8 = int_to_ptr.vmem [resolvable:$true] %s307_s8 }
  0x39   :  { %358 = vmatpush3.bf16.msra.mxu0 %v407_v1  ;;  %378 = vmatpush3.bf16.msra.mxu1 %v416_v4  ;;  %v412_v9 = vld [vmem:[#allocation5 + $0x28] sm:$0xff]   ;;  %v419_v10 = vld [vmem:[#allocation7 + $0x18] sm:$0xff]   ;;  %v413_v11 = vld [vmem:[#allocation5 + $0x30] sm:$0xff]   ;;  %p495_p11 = scmp.lt.s32.totalorder %s308_s8, %s308_s8 }
  0x3a   :  { %359 = vmatprep.subr.bf16.mxu0 %v523_v0  ;;  %379 = vmatprep.subr.bf16.mxu1 %v523_v0  ;;  %v420_v12 = vld [vmem:[#allocation7 + $0x20] sm:$0xff]   ;;  %v414_v13 = vld [vmem:[#allocation5 + $0x38] sm:$0xff]   ;;  %v421_v15 = vld [vmem:[#allocation7 + $0x28] sm:$0xff]  }
  0x3b   :  { %v415_v14 = vld [vmem:[#allocation2] sm:$0xff]   ;;  %v422_v16 = vld [vmem:[#allocation7 + $0x30] sm:$0xff]  }
  0x3c   :  { %v423_v17 = vld [vmem:[#allocation7 + $0x38] sm:$0xff]  }
  0x3d   :  { %360 = vmatpush3.bf16.msra.mxu0 %v408_v2  ;;  %380 = vmatpush3.bf16.msra.mxu1 %v417_v6  ;;  %v320_v18 = vld [vmem:[%s630_s2] ss:$0 sm:$0xff]  ;;  %s490_s2 = scalar_lea.vmem %s308_s8, 256 }
  0x3e   :  { %361 = vmatprep.subr.bf16.mxu0 %v523_v0  ;;  %381 = vmatprep.subr.bf16.mxu1 %v523_v0  ;;  %v330_v30 = vld [vmem:[%s632_s4] ss:$0 sm:$0xff]  ;;  %p491_p10 = scmp.ne.s32.totalorder %s308_s8, %s490_s2  ;;  %p496_p12 = scmp.lt.s32.totalorder %s490_s2, %s490_s2 }
  0x40   :  { %p497_p13 = por %p496_p12, %p495_p11 }
  0x41   :  { %362 = vmatpush3.bf16.msra.mxu0 %v409_v3  ;;  %382 = vmatpush3.bf16.msra.mxu1 %v418_v8 }
  0x42   :  { %363 = vmatprep.subr.bf16.mxu0 %v523_v0  ;;  %383 = vmatprep.subr.bf16.mxu1 %v523_v0  ;;  %p498_p0 = pnand %p497_p13, %p491_p10 }
  0x45   :  { %364 = vmatpush3.bf16.msra.mxu0 %v410_v5  ;;  %384 = vmatpush3.bf16.msra.mxu1 %v419_v10 }
  0x46   :  { %365 = vmatprep.subr.bf16.mxu0 %v523_v0  ;;  %385 = vmatprep.subr.bf16.mxu1 %v523_v0 }
  0x49   :  { %366 = vmatpush3.bf16.msra.mxu0 %v411_v7  ;;  %386 = vmatpush3.bf16.msra.mxu1 %v420_v12 }
  0x4a   :  { %367 = vmatprep.subr.bf16.mxu0 %v523_v0  ;;  %387 = vmatprep.subr.bf16.mxu1 %v523_v0 }
  0x4d   :  { %368 = vmatpush3.bf16.msra.mxu0 %v412_v9  ;;  %388 = vmatpush3.bf16.msra.mxu1 %v421_v15 }
  0x4e   :  { %369 = vmatprep.subr.bf16.mxu0 %v523_v0  ;;  %389 = vmatprep.subr.bf16.mxu1 %v523_v0 }
  0x51   :  { %370 = vmatpush3.bf16.msra.mxu0 %v413_v11  ;;  %390 = vmatpush3.bf16.msra.mxu1 %v422_v16 }
  0x52   :  { %371 = vmatprep.subr.bf16.mxu0 %v523_v0  ;;  %391 = vmatprep.subr.bf16.mxu1 %v523_v0 }
  0x55   :  { %372 = vmatpush3.bf16.msra.mxu0 %v414_v13  ;;  %392 = vmatpush3.bf16.msra.mxu1 %v423_v17 }
  0x58   :  { %374 = vmatmul.mubr.bf16.vlgmr.msra.gmra.mrb[0].mxu0 %v415_v14 }
 0x12b   :  { %v176_v19 = vpop.f32.mrb[0].mxu0 }
 0x12c   :  { %v177_v20 = vadd.f32 %v320_v18, %v176_v19  ;;  %v375_v21 = vpop.f32.mrb[1].mxu0 }
 0x12d   :  { %v179_v22 = vpop.f32.mrb[2].mxu0 }
 0x12e   :  { %v183_v23 = vmul.f32 0.01, %v177_v20  ;;  %v180_v24 = vadd.f32 %v320_v18, %v179_v22  ;;  %v376_v25 = vpop.f32.mrb[3].mxu0 }
 0x130   :  { %v184_v26 = vmul.f32 0.01, %v180_v24  ;;  %v185_v27 = vmax.f32 %v177_v20, %v183_v23 }
 0x132   :  { %v186_v28 = vmax.f32 %v180_v24, %v184_v26 }
 0x134   :  { %v187_v29 = vpack.c.bf16 %v186_v28, %v185_v27 }
 0x136   :  { %394 = vmatmul.mubr.bf16.vlgmr.msra.gmra.mrb[0].mxu1 %v187_v29 }
 0x209   :  { %v293_v31 = vpop.f32.mrb[0].mxu1 }
 0x20a   :  { %v294_v32 = vadd.f32 %v330_v30, %v293_v31  ;;  %v395_v33 = vpop.f32.mrb[1].mxu1 }
 0x20b   :  { %v296_v34 = vpop.f32.mrb[2].mxu1 }
 0x20c   :  { %300 = vst [vmem:[#allocation8] sm:$0xff] %v294_v32  ;;  %v297_v35 = vadd.f32 %v330_v30, %v296_v34  ;;  %v396_v36 = vpop.f32.mrb[3].mxu1 }
 0x20e   :  { %301 = vst [vmem:[#allocation8 + $0x8] sm:$0xff] %v297_v35 }
 0x20f   :  { %501 = shalt.err (!%p498_p0)
}
 0x210   :  { %s502_s10 = scalar_lea.hbm %s633_s5, 256 }
 0x211   :  { %p503_p1 = scmp.ne.s32.totalorder %s633_s5, %s502_s10  ;;  %p506_p2 = scmp.lt.u32.totalorder %s502_s10, %s633_s5 }
 0x213   :  { %p508_p3 = pnand %p506_p2, %p503_p1 }
 0x215   :  { %511 = shalt.err (!%p508_p3)
}
 0x216   :  { %s526_s15 = smov 128   ;;  %s527_s16 = smov 8  }
 0x217   :  { %313 = dma.vmem_to_hbm [thread:$0]  %s308_s8, 256, %s633_s5, [#allocation4], %s526_s15, %s526_s15, %s527_s16  }
 0x218   :  { %516 = dma.done.wait [#allocation4], 256  }
 0x219   :  { %517 = vsyncadd [#allocation4], 4294967040 }
 0x21a   :  { %317 = vsyncpa [#allocation3], 1 }
 0x21b   :  { %318 = vsyncpa [#allocation6], 1 }
 0x21c   :  { %319 = vsyncpa [#allocation4], 1 }

</bundles_post_ra>
